<compile_context>
chip_gen: v7x
topology: tpu7x:2x2x1
jax: 0.10.0
libtpu: 0.0.40
codegen_flags: <defaults>
</compile_context>

<pallas_src>
import jax
import jax.numpy as jnp
from jax import lax
from jax.experimental import pallas as pl
from jax.experimental.pallas import tpu as pltpu


def _round_up(x, m):
    return ((x + m - 1) // m) * m


def _default_compute_dtype():
    """bf16 activations only where the VPU/EUP are bf16-native (v6e, v7x)."""
    try:
        kind = jax.devices()[0].device_kind.lower()
    except Exception:  # pragma: no cover - defensive
        return jnp.float32
    if ("v6" in kind) or ("v7" in kind) or ("7x" in kind):
        return jnp.bfloat16
    return jnp.float32


def _value_net_kernel(x_ref,
                      w1_ref, b1_ref,
                      w2_ref, b2_ref,
                      w3_ref, b3_ref,
                      w4_ref, b4_ref,
                      w5_ref, b5_ref,
                      o_ref):
    """One batch-tile of the ValueNetwork forward pass.

    x_ref : (TB, state_dim)  f32   — states streamed as-is (no HBM transpose)
    w1    : (32, state_dim)  f32
    w2..w4: (32, 32)         compute dtype (bf16 on v6e/v7x, f32 on v5e)
    w5    : (1, 32)          compute dtype
    bK    : (out, 1)         f32
    o_ref : (1, TB)          f32   — lane-dense output slab
    """
    compute_dtype = w2_ref.dtype

    # Layer 1: contract over the shared feature axis so the activation comes
    # out (32, TB) lane-dense (batch on the 128-lane axis) without ever
    # transposing states in HBM.  K = state_dim is tiny; MXU has huge slack.
    y = lax.dot_general(w1_ref[...], x_ref[...],
                        (((1,), (1,)), ((), ())),
                        preferred_element_type=jnp.float32)
    # Bias-add in f32 (VALU slack), tanh in the compute dtype (bf16-native EUP
    # on v6e/v7x); the bf16 result feeds the next MXU op without widening.
    h = jnp.tanh((y + b1_ref[...]).astype(compute_dtype))

    def hidden(h, w_ref, b_ref):
        y = jnp.dot(w_ref[...], h, preferred_element_type=jnp.float32)
        return jnp.tanh((y + b_ref[...]).astype(compute_dtype))
        # (On v5e this whole chain stays f32; a VPU polynomial tanh could
        #  raise the EUP ceiling there if profiling shows it binding.)

    h = hidden(h, w2_ref, b2_ref)
    h = hidden(h, w3_ref, b3_ref)
    h = hidden(h, w4_ref, b4_ref)

    # Final linear layer stays f32; one unmasked store per 128 outputs.
    o_ref[...] = (jnp.dot(w5_ref[...], h, preferred_element_type=jnp.float32)
                  + b5_ref[...])


def value_network_forward(states, params, *, batch_tile=8192, compute_dtype=None):
    """Pallas-backed equivalent of ValueNetwork.forward.

    states : (B, state_dim) array-like (cast to float32, like to_tensor)
    params : list of (W, b) with W shaped (out_features, in_features)
             (PyTorch layout) and b shaped (out_features,)
    returns: (B, 1) float32
    """
    states = jnp.asarray(states, jnp.float32)
    B, state_dim = states.shape
    if B == 0:
        return jnp.zeros((0, 1), jnp.float32)
    if compute_dtype is None:
        compute_dtype = _default_compute_dtype()

    # 128-aligned batch tile.  Cap it so a large batch yields >= 2 grid tiles
    # (v7x has 2 TensorCores; the "parallel" axis is how they get work), and
    # big enough that each x-tile DMA is >= ~128 KB for large batches.
    tb = min(_round_up(batch_tile, 128), _round_up(pl.cdiv(B, 2), 128))
    tb = max(128, tb)
    num_tiles = pl.cdiv(B, tb)

    # Weights in torch (out, in) layout.  Layer-1 weight stays f32 (it
    # contracts against the f32 states); deeper weights match the activation
    # dtype so no widening happens between layers.  Biases stay f32, (out, 1).
    flat_params = []
    for idx, (w, b) in enumerate(params):
        w = jnp.asarray(w, jnp.float32)
        if idx > 0:
            w = w.astype(compute_dtype)
        flat_params.append(w)
        flat_params.append(jnp.asarray(b, jnp.float32).reshape(-1, 1))

    # States stream directly; the ragged last block's out-of-bounds rows are
    # independent batch lanes after the layer-1 contraction (no cross-lane
    # reduction anywhere) and are sliced off below.
    x_spec = pl.BlockSpec((tb, state_dim), lambda i: (i, 0))
    # Weights/biases (~14 KB total) are whole-array VMEM-resident every step.
    param_specs = [pl.BlockSpec(p.shape, lambda i: (0, 0)) for p in flat_params]
    out_spec = pl.BlockSpec((1, tb), lambda i: (0, i))

    out_fm = pl.pallas_call(
        _value_net_kernel,
        out_shape=jax.ShapeDtypeStruct((1, num_tiles * tb), jnp.float32),
        grid_spec=pltpu.PrefetchScalarGridSpec(
            num_scalar_prefetch=0,
            grid=(num_tiles,),
            in_specs=[x_spec] + param_specs,
            out_specs=out_spec,
        ),
        compiler_params=pltpu.CompilerParams(
            dimension_semantics=("parallel",)),  # megacore-shardable on v7x
    )(states, *flat_params)

    return out_fm[0, :B].reshape(B, 1)


def init_value_network_params(key, state_dim, hidden_dim=32):
    """PyTorch-style init: U(-1/sqrt(fan_in), 1/sqrt(fan_in)).

    Weights use the torch (out_features, in_features) layout; biases are 1-D.
    """
    dims = [state_dim, hidden_dim, hidden_dim, hidden_dim, hidden_dim, 1]
    params = []
    for fan_in, fan_out in zip(dims[:-1], dims[1:]):
        key, kw, kb = jax.random.split(key, 3)
        bound = float(fan_in) ** -0.5
        w = jax.random.uniform(kw, (fan_out, fan_in), jnp.float32, -bound, bound)
        b = jax.random.uniform(kb, (fan_out,), jnp.float32, -bound, bound)
        params.append((w, b))
    return params


def _reference_forward(states, params, compute_dtype=jnp.float32):
    """Pure-JAX reference mirroring the kernel's dtype policy."""
    h = jnp.asarray(states, jnp.float32)
    n = len(params)
    for i, (w, b) in enumerate(params):
        w = jnp.asarray(w, jnp.float32)
        if i > 0:
            w = w.astype(compute_dtype)
        y = jnp.dot(h, w.T, preferred_element_type=jnp.float32)
        y = y + jnp.asarray(b, jnp.float32).reshape(1, -1)
        if i < n - 1:
            h = jnp.tanh(y.astype(compute_dtype))
        else:
            h = y
    return h


if __name__ == "__main__":
    key = jax.random.PRNGKey(0)
    k_params, k_states = jax.random.split(key)

    state_dim = 8
    hidden_dim = 32
    batch = 16  # small, not tile-aligned — exercises the ragged-edge path

    params = init_value_network_params(k_params, state_dim, hidden_dim)
    states = jax.random.normal(k_states, (batch, state_dim), jnp.float32)

    compute_dtype = _default_compute_dtype()
    out = value_network_forward(states, params, compute_dtype=compute_dtype)
    out = jax.block_until_ready(out)

    ref = _reference_forward(states, params, compute_dtype=compute_dtype)
    assert out.shape == (batch, 1)
    tol = 1e-5 if jnp.dtype(compute_dtype) == jnp.dtype(jnp.float32) else 2e-2
    assert jnp.allclose(out, ref, atol=tol, rtol=tol), "mismatch vs reference"

    print("KERNEL_OK")
</pallas_src>

<mosaic_0001>
module attributes {stable_mosaic.version = 11 : i64} {
  func.func @_value_net_kernel(%arg0: i32, %arg1: memref<128x8xf32, #tpu.memory_space<vmem>>, %arg2: memref<32x8xf32, #tpu.memory_space<vmem>>, %arg3: memref<32x1xf32, #tpu.memory_space<vmem>>, %arg4: memref<32x32xf32, #tpu.memory_space<vmem>>, %arg5: memref<32x1xf32, #tpu.memory_space<vmem>>, %arg6: memref<32x32xf32, #tpu.memory_space<vmem>>, %arg7: memref<32x1xf32, #tpu.memory_space<vmem>>, %arg8: memref<32x32xf32, #tpu.memory_space<vmem>>, %arg9: memref<32x1xf32, #tpu.memory_space<vmem>>, %arg10: memref<1x32xf32, #tpu.memory_space<vmem>>, %arg11: memref<1x1xf32, #tpu.memory_space<vmem>>, %arg12: memref<1x128xf32, #tpu.memory_space<vmem>>) attributes {dimension_semantics = [#tpu.dimension_semantics<parallel>], iteration_bounds = array<i64: 1>, scalar_prefetch = 0 : i64, scratch_operands = 0 : i64, tpu.core_type = #tpu.core_type<tc>, window_params = [{transform_indices = @transform_0, window_bounds = array<i64: 128, 8>}, {pipeline_mode = #tpu.pipeline_mode<synchronous>, transform_indices = @transform_1, window_bounds = array<i64: 32, 8>}, {pipeline_mode = #tpu.pipeline_mode<synchronous>, transform_indices = @transform_2, window_bounds = array<i64: 32, 1>}, {pipeline_mode = #tpu.pipeline_mode<synchronous>, transform_indices = @transform_3, window_bounds = array<i64: 32, 32>}, {pipeline_mode = #tpu.pipeline_mode<synchronous>, transform_indices = @transform_4, window_bounds = array<i64: 32, 1>}, {pipeline_mode = #tpu.pipeline_mode<synchronous>, transform_indices = @transform_5, window_bounds = array<i64: 32, 32>}, {pipeline_mode = #tpu.pipeline_mode<synchronous>, transform_indices = @transform_6, window_bounds = array<i64: 32, 1>}, {pipeline_mode = #tpu.pipeline_mode<synchronous>, transform_indices = @transform_7, window_bounds = array<i64: 32, 32>}, {pipeline_mode = #tpu.pipeline_mode<synchronous>, transform_indices = @transform_8, window_bounds = array<i64: 32, 1>}, {pipeline_mode = #tpu.pipeline_mode<synchronous>, transform_indices = @transform_9, window_bounds = array<i64: 1, 32>}, {pipeline_mode = #tpu.pipeline_mode<synchronous>, transform_indices = @transform_10, window_bounds = array<i64: 1, 1>}, {transform_indices = @transform_11, window_bounds = array<i64: 1, 128>}]} {
    %c0 = arith.constant 0 : index
    %c0_0 = arith.constant 0 : index
    %0 = vector.load %arg2[%c0, %c0_0] : memref<32x8xf32, #tpu.memory_space<vmem>>, vector<32x8xf32>
    %c0_1 = arith.constant 0 : index
    %c0_2 = arith.constant 0 : index
    %1 = vector.load %arg1[%c0_1, %c0_2] : memref<128x8xf32, #tpu.memory_space<vmem>>, vector<128x8xf32>
    %cst = arith.constant dense<0.000000e+00> : vector<32x128xf32>
    %2 = tpu.matmul %0, %1, %cst {dimension_numbers = #tpu.dot_dimension_numbers<[1], [1], [0], [0], [0, 0, 1, 0], [], []>} : vector<32x8xf32>, vector<128x8xf32>, vector<32x128xf32> -> vector<32x128xf32>
    %c0_3 = arith.constant 0 : index
    %c0_4 = arith.constant 0 : index
    %3 = vector.load %arg3[%c0_3, %c0_4] : memref<32x1xf32, #tpu.memory_space<vmem>>, vector<32x1xf32>
    %4 = vector.broadcast %3 : vector<32x1xf32> to vector<32x128xf32>
    %5 = arith.addf %2, %4 : vector<32x128xf32>
    %6 = math.tanh %5 : vector<32x128xf32>
    %c0_5 = arith.constant 0 : index
    %c0_6 = arith.constant 0 : index
    %7 = vector.load %arg4[%c0_5, %c0_6] : memref<32x32xf32, #tpu.memory_space<vmem>>, vector<32x32xf32>
    %cst_7 = arith.constant dense<0.000000e+00> : vector<32x128xf32>
    %8 = tpu.matmul %7, %6, %cst_7 {dimension_numbers = #tpu.dot_dimension_numbers<[1], [0], [0], [1], [0, 0, 1, 1], [], []>} : vector<32x32xf32>, vector<32x128xf32>, vector<32x128xf32> -> vector<32x128xf32>
    %c0_8 = arith.constant 0 : index
    %c0_9 = arith.constant 0 : index
    %9 = vector.load %arg5[%c0_8, %c0_9] : memref<32x1xf32, #tpu.memory_space<vmem>>, vector<32x1xf32>
    %10 = vector.broadcast %9 : vector<32x1xf32> to vector<32x128xf32>
    %11 = arith.addf %8, %10 : vector<32x128xf32>
    %12 = math.tanh %11 : vector<32x128xf32>
    %c0_10 = arith.constant 0 : index
    %c0_11 = arith.constant 0 : index
    %13 = vector.load %arg6[%c0_10, %c0_11] : memref<32x32xf32, #tpu.memory_space<vmem>>, vector<32x32xf32>
    %cst_12 = arith.constant dense<0.000000e+00> : vector<32x128xf32>
    %14 = tpu.matmul %13, %12, %cst_12 {dimension_numbers = #tpu.dot_dimension_numbers<[1], [0], [0], [1], [0, 0, 1, 1], [], []>} : vector<32x32xf32>, vector<32x128xf32>, vector<32x128xf32> -> vector<32x128xf32>
    %c0_13 = arith.constant 0 : index
    %c0_14 = arith.constant 0 : index
    %15 = vector.load %arg7[%c0_13, %c0_14] : memref<32x1xf32, #tpu.memory_space<vmem>>, vector<32x1xf32>
    %16 = vector.broadcast %15 : vector<32x1xf32> to vector<32x128xf32>
    %17 = arith.addf %14, %16 : vector<32x128xf32>
    %18 = math.tanh %17 : vector<32x128xf32>
    %c0_15 = arith.constant 0 : index
    %c0_16 = arith.constant 0 : index
    %19 = vector.load %arg8[%c0_15, %c0_16] : memref<32x32xf32, #tpu.memory_space<vmem>>, vector<32x32xf32>
    %cst_17 = arith.constant dense<0.000000e+00> : vector<32x128xf32>
    %20 = tpu.matmul %19, %18, %cst_17 {dimension_numbers = #tpu.dot_dimension_numbers<[1], [0], [0], [1], [0, 0, 1, 1], [], []>} : vector<32x32xf32>, vector<32x128xf32>, vector<32x128xf32> -> vector<32x128xf32>
    %c0_18 = arith.constant 0 : index
    %c0_19 = arith.constant 0 : index
    %21 = vector.load %arg9[%c0_18, %c0_19] : memref<32x1xf32, #tpu.memory_space<vmem>>, vector<32x1xf32>
    %22 = vector.broadcast %21 : vector<32x1xf32> to vector<32x128xf32>
    %23 = arith.addf %20, %22 : vector<32x128xf32>
    %24 = math.tanh %23 : vector<32x128xf32>
    %c0_20 = arith.constant 0 : index
    %c0_21 = arith.constant 0 : index
    %25 = vector.load %arg10[%c0_20, %c0_21] : memref<1x32xf32, #tpu.memory_space<vmem>>, vector<1x32xf32>
    %cst_22 = arith.constant dense<0.000000e+00> : vector<1x128xf32>
    %26 = tpu.matmul %25, %24, %cst_22 {dimension_numbers = #tpu.dot_dimension_numbers<[1], [0], [0], [1], [0, 0, 1, 1], [], []>} : vector<1x32xf32>, vector<32x128xf32>, vector<1x128xf32> -> vector<1x128xf32>
    %c0_23 = arith.constant 0 : index
    %c0_24 = arith.constant 0 : index
    %27 = vector.load %arg11[%c0_23, %c0_24] : memref<1x1xf32, #tpu.memory_space<vmem>>, vector<1x1xf32>
    %28 = vector.broadcast %27 : vector<1x1xf32> to vector<1x128xf32>
    %29 = arith.addf %26, %28 : vector<1x128xf32>
    %c0_25 = arith.constant 0 : index
    %c0_26 = arith.constant 0 : index
    %30 = vector.load %arg12[%c0_25, %c0_26] : memref<1x128xf32, #tpu.memory_space<vmem>>, vector<1x128xf32>
    tpu.vector_store %arg12[%c0_25, %c0_26], %29 {strides = array<i32>} : memref<1x128xf32, #tpu.memory_space<vmem>>, vector<1x128xf32>,
    return
  }
  func.func @transform_0(%arg0: i32) -> (i32, i32) {
    %c0_i32 = arith.constant 0 : i32
    %c0_i32_0 = arith.constant 0 : i32
    return %arg0, %c0_i32 : i32, i32
  }
  func.func @transform_1(%arg0: i32) -> (i32, i32) {
    %c0_i32 = arith.constant 0 : i32
    %c0_i32_0 = arith.constant 0 : i32
    %c0_i32_1 = arith.constant 0 : i32
    return %c0_i32, %c0_i32_0 : i32, i32
  }
  func.func @transform_2(%arg0: i32) -> (i32, i32) {
    %c0_i32 = arith.constant 0 : i32
    %c0_i32_0 = arith.constant 0 : i32
    %c0_i32_1 = arith.constant 0 : i32
    return %c0_i32, %c0_i32_0 : i32, i32
  }
  func.func @transform_3(%arg0: i32) -> (i32, i32) {
    %c0_i32 = arith.constant 0 : i32
    %c0_i32_0 = arith.constant 0 : i32
    %c0_i32_1 = arith.constant 0 : i32
    return %c0_i32, %c0_i32_0 : i32, i32
  }
  func.func @transform_4(%arg0: i32) -> (i32, i32) {
    %c0_i32 = arith.constant 0 : i32
    %c0_i32_0 = arith.constant 0 : i32
    %c0_i32_1 = arith.constant 0 : i32
    return %c0_i32, %c0_i32_0 : i32, i32
  }
  func.func @transform_5(%arg0: i32) -> (i32, i32) {
    %c0_i32 = arith.constant 0 : i32
    %c0_i32_0 = arith.constant 0 : i32
    %c0_i32_1 = arith.constant 0 : i32
    return %c0_i32, %c0_i32_0 : i32, i32
  }
  func.func @transform_6(%arg0: i32) -> (i32, i32) {
    %c0_i32 = arith.constant 0 : i32
    %c0_i32_0 = arith.constant 0 : i32
    %c0_i32_1 = arith.constant 0 : i32
    return %c0_i32, %c0_i32_0 : i32, i32
  }
  func.func @transform_7(%arg0: i32) -> (i32, i32) {
    %c0_i32 = arith.constant 0 : i32
    %c0_i32_0 = arith.constant 0 : i32
    %c0_i32_1 = arith.constant 0 : i32
    return %c0_i32, %c0_i32_0 : i32, i32
  }
  func.func @transform_8(%arg0: i32) -> (i32, i32) {
    %c0_i32 = arith.constant 0 : i32
    %c0_i32_0 = arith.constant 0 : i32
    %c0_i32_1 = arith.constant 0 : i32
    return %c0_i32, %c0_i32_0 : i32, i32
  }
  func.func @transform_9(%arg0: i32) -> (i32, i32) {
    %c0_i32 = arith.constant 0 : i32
    %c0_i32_0 = arith.constant 0 : i32
    %c0_i32_1 = arith.constant 0 : i32
    return %c0_i32, %c0_i32_0 : i32, i32
  }
  func.func @transform_10(%arg0: i32) -> (i32, i32) {
    %c0_i32 = arith.constant 0 : i32
    %c0_i32_0 = arith.constant 0 : i32
    %c0_i32_1 = arith.constant 0 : i32
    return %c0_i32, %c0_i32_0 : i32, i32
  }
  func.func @transform_11(%arg0: i32) -> (i32, i32) {
    %c0_i32 = arith.constant 0 : i32
    %c0_i32_0 = arith.constant 0 : i32
    return %c0_i32, %arg0 : i32, i32
  }
}

</mosaic_0001>

<bundles_post_ra>
// kernel: tpu_custom_call.1
= control target key start
LH: loop header
LB: loop body
LE: loop exit
PB: predicated region body
PF: predicated region fallthrough
CT: control target
= control target key end

     0   :  { %s1318_s0 = inlined_call_operand.vmem [shape: f32[16,8], index: 0, kind: input, shape index: {}]   ;;  %s1319_s1 = inlined_call_operand.vmem [shape: f32[32,8], index: 1, kind: input, shape index: {}]   ;;  %s1320_s2 = inlined_call_operand.vmem [shape: f32[32,1], index: 2, kind: input, shape index: {}]   ;;  %s1321_s3 = inlined_call_operand.vmem [shape: f32[32,32], index: 3, kind: input, shape index: {}]   ;;  %s1322_s4 = inlined_call_operand.vmem [shape: f32[32,1], index: 4, kind: input, shape index: {}]   ;;  %s1323_s5 = inlined_call_operand.vmem [shape: f32[32,32], index: 5, kind: input, shape index: {}]   ;;  %s1324_s6 = inlined_call_operand.vmem [shape: f32[32,1], index: 6, kind: input, shape index: {}]   ;;  %s1325_s7 = inlined_call_operand.vmem [shape: f32[32,32], index: 7, kind: input, shape index: {}]   ;;  %s1326_s8 = inlined_call_operand.vmem [shape: f32[32,1], index: 8, kind: input, shape index: {}]   ;;  %s1327_s9 = inlined_call_operand.vmem [shape: f32[1,32], index: 9, kind: input, shape index: {}]   ;;  %s1328_s10 = inlined_call_operand.<no memory space> [shape: f32[1,1], index: 10, kind: input, shape index: {}]   ;;  %s1329_s11 = inlined_call_operand.hbm [shape: f32[1,128], index: 11, kind: output, shape index: {}]  }
   0x1   :  { %v16_v0 = vstv %s1328_s10 }
   0x2   :  { %17 = vst [vmem:[#allocation2] sm:$0x1] %v16_v0 }
   0x3   :  { %v45_v1 = vld [vmem:[%s1318_s0] sm:$0xff]  ;;  %v46_v2 = vld [vmem:[%s1318_s0 + $0x8] sm:$0xff]  ;;  %vm85_vm0 = vcmask 64512   ;;  %v47_v3 = vld [vmem:[%s1318_s0 + $0x10] sm:$0xff]  ;;  %v1036_v7 = vmov 0  }
   0x4   :  { %v895_v4 = vpack.c.bf16 %v46_v2, %v45_v1  ;;  %vm1115_vm1 = vmpackc.low %vm85_vm0, %vm85_vm0  ;;  %v48_v6 = vld [vmem:[%s1318_s0 + $0x18] sm:$0xff]  ;;  %978 = vset.pattern.permute.xlu0 %v1036_v7  ;;  %979 = vset.pattern.permute.xlu1 %v1036_v7  ;;  %v41_v9 = vld [vmem:[%s1319_s1] sm:$0xff] }
   0x5   :  { %v901_v8 = vpack.c.bf16 %v48_v6, %v47_v3  ;;  %v49_v10 = vld [vmem:[%s1318_s0 + $0x20] sm:$0xff]  ;;  %v50_v11 = vld [vmem:[%s1318_s0 + $0x28] sm:$0xff]  ;;  %836 = vmatprep.mubr.msk.f32.mxu0 %vm85_vm0, %v41_v9  ;;  %v63_v13 = vld [vmem:[%s1320_s2 + $0x10] sm:$0xff] }
   0x6   :  { %897 = vmatprep.subr.msk.bf16.mxu0 %vm1115_vm1, %v895_v4  ;;  %v61_v12 = vld [vmem:[%s1320_s2] sm:$0xff]  ;;  %77 = vperm.xlu1 %979, %v63_v13   ;;  %v907_v14 = vpack.c.bf16 %v50_v11, %v49_v10  ;;  %v62_v15 = vld [vmem:[%s1320_s2 + $0x8] sm:$0xff]  ;;  %v64_v16 = vld [vmem:[%s1320_s2 + $0x18] sm:$0xff] }
   0x7   :  { %900 = vmatpush3.bf16.xpose.msk.msra.mxu0 %vm1115_vm1, %v895_v4  ;;  %67 = vperm.xlu0 %978, %v61_v12  }
   0x8   :  { %903 = vmatprep.subr.msk.bf16.mxu0 %vm1115_vm1, %v901_v8 }
   0xb   :  { %72 = vperm.xlu0 %978, %v62_v15  }
   0xf   :  { %906 = vmatpush3.bf16.xpose.msk.msra.mxu0 %vm1115_vm1, %v901_v8 }
  0x10   :  { %18 = vsyncpa [#allocation4], 0  ;;  %909 = vmatprep.subr.msk.bf16.mxu0 %vm1115_vm1, %v907_v14  ;;  %v239_v17 = vld [vmem:[%s1322_s4] sm:$0xff]  ;;  %82 = vperm.xlu1 %979, %v64_v16   ;;  %v51_v18 = vld [vmem:[%s1318_s0 + $0x30] sm:$0xff]  ;;  %vm263_vm2 = vcmask 261120   ;;  %vm1038_vm3 = vmmov 0  }
  0x11   :  { %v52_v19 = vld [vmem:[%s1318_s0 + $0x38] sm:$0xff]  ;;  %v240_v20 = vld [vmem:[%s1322_s4 + $0x8] sm:$0xff]  ;;  %245 = vperm.xlu0 %978, %v239_v17   ;;  %v241_v22 = vld [vmem:[%s1322_s4 + $0x10] sm:$0xff]  ;;  %s1040_s22 = smov [#allocation3]  }
  0x12   :  { %v913_v21 = vpack.c.bf16 %v52_v19, %v51_v18  ;;  %v242_v23 = vld [vmem:[%s1322_s4 + $0x18] sm:$0xff]  ;;  %v369_v24 = vld [vmem:[%s1324_s6] sm:$0xff]  ;;  %v54_v26 = vld [vmem:[%s1318_s0 + $0x48] sm:$0xff] }
  0x13   :  { %v53_v25 = vld [vmem:[%s1318_s0 + $0x40] sm:$0xff]  ;;  %v370_v27 = vld [vmem:[%s1324_s6 + $0x8] sm:$0xff]  ;;  %v371_v29 = vld [vmem:[%s1324_s6 + $0x10] sm:$0xff] }
  0x14   :  { %250 = vperm.xlu1 %979, %v240_v20   ;;  %v919_v28 = vpack.c.bf16 %v54_v26, %v53_v25  ;;  %v372_v30 = vld [vmem:[%s1324_s6 + $0x18] sm:$0xff]  ;;  %v498_v31 = vld [vmem:[%s1326_s8] sm:$0xff]  ;;  %v55_v32 = vld [vmem:[%s1318_s0 + $0x50] sm:$0xff] }
  0x15   :  { %255 = vperm.xlu0 %978, %v241_v22   ;;  %v56_v33 = vld [vmem:[%s1318_s0 + $0x58] sm:$0xff]  ;;  %v499_v34 = vld [vmem:[%s1326_s8 + $0x8] sm:$0xff]  ;;  %v500_v36 = vld [vmem:[%s1326_s8 + $0x10] sm:$0xff] }
  0x16   :  { %v925_v35 = vpack.c.bf16 %v56_v33, %v55_v32  ;;  %v501_v37 = vld [vmem:[%s1326_s8 + $0x18] sm:$0xff]  ;;  %v624_v38 = vld [vmem:[#allocation2] sm:$0x1]  ;;  %v58_v40 = vld [vmem:[%s1318_s0 + $0x68] sm:$0xff] }
  0x17   :  { %912 = vmatpush3.bf16.xpose.msk.msra.mxu0 %vm1115_vm1, %v907_v14  ;;  %v57_v39 = vld [vmem:[%s1318_s0 + $0x60] sm:$0xff]  ;;  %v59_v42 = vld [vmem:[%s1318_s0 + $0x70] sm:$0xff]  ;;  %v60_v43 = vld [vmem:[%s1318_s0 + $0x78] sm:$0xff]  ;;  %s714_s0 = sshll.u32 %s1040_s22, 4  ;;  %s715_s0 = int_to_ptr.vmem [resolvable:$true] %s714_s0 }
  0x18   :  { %915 = vmatprep.subr.msk.bf16.mxu0 %vm1115_vm1, %v913_v21  ;;  %260 = vperm.xlu1 %979, %v242_v23   ;;  %v931_v41 = vpack.c.bf16 %v58_v40, %v57_v39  ;;  %v937_v44 = vpack.c.bf16 %v60_v43, %v59_v42  ;;  %v42_v45 = vld [vmem:[%s1319_s1 + $0x8] sm:$0xff]  ;;  %v43_v46 = vld [vmem:[%s1319_s1 + $0x10] sm:$0xff]  ;;  %v44_v47 = vld [vmem:[%s1319_s1 + $0x18] sm:$0xff]  ;;  %s1012_s23 = scalar_lea.vmem %s715_s0, 16  ;;  %s1016_s24 = scalar_lea.vmem %s715_s0, 32 }
  0x19   :  { %375 = vperm.xlu0 %978, %v369_v24   ;;  %v235_v48 = vld [vmem:[%s1321_s3] sm:$0xff]  ;;  %v236_v3 = vld [vmem:[%s1321_s3 + $0x8] sm:$0xff]  ;;  %v237_v4 = vld [vmem:[%s1321_s3 + $0x10] sm:$0xff]  ;;  %p1013_p0 = scmp.ne.s32.totalorder %s715_s0, %s1012_s23  ;;  %p1017_p1 = scmp.lt.s32.totalorder %s715_s0, %s715_s0 }
  0x1a   :  { %850 = vmatprep.mubr.msk.f32.mxu1 %vm263_vm2, %v235_v48  ;;  %v238_v5 = vld [vmem:[%s1321_s3 + $0x18] sm:$0xff]  ;;  %v365_v6 = vld [vmem:[%s1323_s5] sm:$0xff]  ;;  %v366_v25 = vld [vmem:[%s1323_s5 + $0x8] sm:$0xff]  ;;  %p1018_p2 = scmp.lt.s32.totalorder %s1016_s24, %s1012_s23 }
  0x1b   :  { %v367_v26 = vld [vmem:[%s1323_s5 + $0x10] sm:$0xff] }
  0x1c   :  { %380 = vperm.xlu1 %979, %v370_v27   ;;  %v368_v27 = vld [vmem:[%s1323_s5 + $0x18] sm:$0xff]  ;;  %v496_v48 = vld [vmem:[%s1325_s7 + $0x10] sm:$0xff]  ;;  %p1019_p3 = por %p1018_p2, %p1017_p1 }
  0x1d   :  { %385 = vperm.xlu0 %978, %v371_v29  }
  0x1e   :  { %p1020_p4 = pnand %p1019_p3, %p1013_p0 }
  0x1f   :  { %918 = vmatpush3.bf16.xpose.msk.msra.mxu0 %vm1115_vm1, %v913_v21 }
  0x20   :  { %921 = vmatprep.subr.msk.bf16.mxu0 %vm1115_vm1, %v919_v28  ;;  %390 = vperm.xlu1 %979, %v372_v30  }
  0x21   :  { %504 = vperm.xlu0 %978, %v498_v31  }
  0x24   :  { %509 = vperm.xlu1 %979, %v499_v34  }
  0x25   :  { %514 = vperm.xlu0 %978, %v500_v36  }
  0x27   :  { %924 = vmatpush3.bf16.xpose.msk.msra.mxu0 %vm1115_vm1, %v919_v28  ;;  %v494_v28 = vld [vmem:[%s1325_s7] sm:$0xff] }
  0x28   :  { %927 = vmatprep.subr.msk.bf16.mxu0 %vm1115_vm1, %v925_v35  ;;  %519 = vperm.xlu1 %979, %v501_v37  }
  0x29   :  { %627 = vperm.xlu0 %978, %v624_v38  }
  0x2f   :  { %930 = vmatpush3.bf16.xpose.msk.msra.mxu0 %vm1115_vm1, %v925_v35 }
  0x30   :  { %933 = vmatprep.subr.msk.bf16.mxu0 %vm1115_vm1, %v931_v41 }
  0x37   :  { %936 = vmatpush3.bf16.xpose.msk.msra.mxu0 %vm1115_vm1, %v931_v41 }
  0x38   :  { %939 = vmatprep.subr.msk.bf16.mxu0 %vm1115_vm1, %v937_v44 }
  0x3f   :  { %942 = vmatpush3.bf16.xpose.msk.msra.mxu0 %vm1115_vm1, %v937_v44 }
  0x46   :  { %837 = vmatmul.mubr.msk.f32.vlgmr.msra.gmra.mrb[0].mxu0 %vm85_vm0, %v42_v45 }
  0x47   :  { %839 = vmatprep.mubr.msk.f32.mxu0 %vm85_vm0, %v43_v46 }
  0x4a   :  { %840 = vmatmul.mubr.msk.f32.gmra.mrb[2].mxu0 %vm85_vm0, %v44_v47  ;;  %v495_v47 = vld [vmem:[%s1325_s7 + $0x8] sm:$0xff] }
  0x85   :  { %v78_v50 = vpop.permute.xlu1 %77 }
  0x86   :  { %v68_v49 = vpop.permute.xlu0 %67 }
  0x8a   :  { %v73_v51 = vpop.permute.xlu0 %72 }
  0x8f   :  { %v83_v56 = vpop.permute.xlu1 %82 }
  0x90   :  { %v246_v8 = vpop.permute.xlu0 %245 }
  0x93   :  { %v251_v7 = vpop.permute.xlu1 %250 }
  0x94   :  { %v256_v15 = vpop.permute.xlu0 %255 }
  0x97   :  { %v261_v13 = vpop.permute.xlu1 %260 }
  0x98   :  { %v376_v30 = vpop.permute.xlu0 %375 }
  0x9b   :  { %v381_v29 = vpop.permute.xlu1 %380 }
  0x9c   :  { %v386_v37 = vpop.permute.xlu0 %385 }
  0x9f   :  { %v391_v35 = vpop.permute.xlu1 %390 }
 0x119   :  { %v838_v52 = vpop.f32.mrb[0].mxu0 }
 0x11a   :  { %v218_v53 = vadd.f32 %v838_v52, %v73_v51  ;;  %v212_v54 = vpop.f32.mrb[1].mxu0  ;;  %v1039_v51 = vmov 0.0   ;;  %v510_v52 = vpop.permute.xlu1 %509 }
 0x11b   :  { %v213_v55 = vadd.f32 %v212_v54, %v68_v49  ;;  %v497_v49 = vld [vmem:[%s1325_s7 + $0x18] sm:$0xff] }
 0x11c   :  { %980 = vtanh.f32 %v218_v53  ;;  %v505_v53 = vpop.permute.xlu0 %504 }
 0x11d   :  { %982 = vtanh.f32 %v213_v55  ;;  %v841_v57 = vpop.f32.mrb[2].mxu0 }
 0x11e   :  { %v228_v58 = vadd.f32 %v841_v57, %v83_v56  ;;  %v222_v59 = vpop.f32.mrb[3].mxu0 }
 0x11f   :  { %v223_v60 = vadd.f32 %v222_v59, %v78_v50  ;;  %v1037_v50 = vmov 0.0|0.0  }
 0x120   :  { %984 = vtanh.f32 %v228_v58  ;;  %v520_v58 = vpop.permute.xlu1 %519 }
 0x121   :  { %986 = vtanh.f32 %v223_v60  ;;  %v515_v60 = vpop.permute.xlu0 %514 }
 0x126   :  { %v981_v61 = vpop.eup %980 }
 0x127   :  { %v983_v62 = vpop.eup %982 }
 0x128   :  { %v943_v63 = vpack.c.bf16 %v981_v61, %v983_v62 }
 0x12a   :  { %v985_v0 = vpop.eup %984  ;;  %944 = vmatprep.subr.bf16.mxu1 %v943_v63 }
 0x12b   :  { %v987_v1 = vpop.eup %986  ;;  %946 = vmatpush3.bf16.msra.mxu1 %v943_v63 }
 0x12c   :  { %v947_v2 = vpack.c.bf16 %v985_v0, %v987_v1 }
 0x12e   :  { %948 = vmatprep.subr.bf16.mxu1 %v947_v2 }
 0x12f   :  { %950 = vmatpush3.bf16.msra.mxu1 %v947_v2 }
 0x132   :  { %851 = vmatmul.mubr.msk.f32.vlgmr.msra.gmra.mrb[0].mxu1 %vm263_vm2, %v236_v3 }
 0x133   :  { %853 = vmatprep.mubr.msk.f32.mxu1 %vm263_vm2, %v237_v4 }
 0x136   :  { %854 = vmatmul.mubr.msk.f32.gmra.mrb[2].mxu1 %vm263_vm2, %v238_v5 }
 0x137   :  { %864 = vmatprep.mubr.msk.f32.mxu1 %vm263_vm2, %v365_v6  ;;  %v623_v6 = vld [vmem:[%s1327_s9] sm:$0x1] }
 0x205   :  { %v852_v9 = vpop.f32.mrb[0].mxu1 }
 0x206   :  { %v348_v10 = vadd.f32 %v852_v9, %v251_v7  ;;  %v342_v11 = vpop.f32.mrb[1].mxu1  ;;  %v630_v7 = vlaneseq }
 0x207   :  { %v343_v12 = vadd.f32 %v342_v11, %v246_v8 }
 0x208   :  { %988 = vtanh.f32 %v348_v10  ;;  %v631_v8 = vshrl.u32 %v630_v7, 7  ;;  %v628_v10 = vpop.permute.xlu0 %627 }
 0x209   :  { %990 = vtanh.f32 %v343_v12  ;;  %v855_v14 = vpop.f32.mrb[2].mxu1 }
 0x20a   :  { %v358_v16 = vadd.f32 %v855_v14, %v261_v13  ;;  %v352_v17 = vpop.f32.mrb[3].mxu1  ;;  %v632_v9 = vsub.s32 0, %v631_v8 }
 0x20b   :  { %v353_v18 = vadd.f32 %v352_v17, %v256_v15 }
 0x20c   :  { %992 = vtanh.f32 %v358_v16  ;;  %v633_v11 = vrot.slane %v628_v10, %v632_v9 }
 0x20d   :  { %994 = vtanh.f32 %v353_v18 }
 0x212   :  { %v989_v19 = vpop.eup %988 }
 0x213   :  { %v991_v20 = vpop.eup %990 }
 0x214   :  { %v951_v21 = vpack.c.bf16 %v989_v19, %v991_v20 }
 0x216   :  { %v993_v22 = vpop.eup %992  ;;  %952 = vmatprep.subr.bf16.mxu1 %v951_v21 }
 0x217   :  { %v995_v23 = vpop.eup %994  ;;  %954 = vmatpush3.bf16.msra.mxu1 %v951_v21 }
 0x218   :  { %v955_v24 = vpack.c.bf16 %v993_v22, %v995_v23 }
 0x21a   :  { %956 = vmatprep.subr.bf16.mxu1 %v955_v24 }
 0x21b   :  { %958 = vmatpush3.bf16.msra.mxu1 %v955_v24 }
 0x21e   :  { %865 = vmatmul.mubr.msk.f32.vlgmr.msra.gmra.mrb[4].mxu1 %vm263_vm2, %v366_v25 }
 0x21f   :  { %867 = vmatprep.mubr.msk.f32.mxu1 %vm263_vm2, %v367_v26 }
 0x222   :  { %868 = vmatmul.mubr.msk.f32.gmra.mrb[6].mxu1 %vm263_vm2, %v368_v27 }
 0x223   :  { %878 = vmatprep.mubr.msk.f32.mxu1 %vm263_vm2, %v494_v28 }
 0x2f1   :  { %v866_v31 = vpop.f32.mrb[4].mxu1 }
 0x2f2   :  { %v477_v32 = vadd.f32 %v866_v31, %v381_v29  ;;  %v471_v33 = vpop.f32.mrb[5].mxu1 }
 0x2f3   :  { %v472_v34 = vadd.f32 %v471_v33, %v376_v30 }
 0x2f4   :  { %996 = vtanh.f32 %v477_v32 }
 0x2f5   :  { %998 = vtanh.f32 %v472_v34  ;;  %v869_v36 = vpop.f32.mrb[6].mxu1 }
 0x2f6   :  { %v487_v38 = vadd.f32 %v869_v36, %v391_v35  ;;  %v481_v39 = vpop.f32.mrb[7].mxu1 }
 0x2f7   :  { %v482_v40 = vadd.f32 %v481_v39, %v386_v37 }
 0x2f8   :  { %1000 = vtanh.f32 %v487_v38 }
 0x2f9   :  { %1002 = vtanh.f32 %v482_v40 }
 0x2fe   :  { %v997_v41 = vpop.eup %996 }
 0x2ff   :  { %v999_v42 = vpop.eup %998 }
 0x300   :  { %v959_v43 = vpack.c.bf16 %v997_v41, %v999_v42 }
 0x302   :  { %v1001_v44 = vpop.eup %1000  ;;  %960 = vmatprep.subr.bf16.mxu1 %v959_v43 }
 0x303   :  { %v1003_v45 = vpop.eup %1002  ;;  %962 = vmatpush3.bf16.msra.mxu1 %v959_v43 }
 0x304   :  { %v963_v46 = vpack.c.bf16 %v1001_v44, %v1003_v45 }
 0x306   :  { %964 = vmatprep.subr.bf16.mxu1 %v963_v46 }
 0x307   :  { %966 = vmatpush3.bf16.msra.mxu1 %v963_v46 }
 0x308   :  { %967 = vmatprep.subr.bf16.mxu1 %v1037_v50 }
 0x30a   :  { %879 = vmatmul.mubr.msk.f32.vlgmr.msra.gmra.mrb[8].mxu1 %vm263_vm2, %v495_v47 }
 0x30b   :  { %881 = vmatprep.mubr.msk.f32.mxu1 %vm263_vm2, %v496_v48 }
 0x30e   :  { %882 = vmatmul.mubr.msk.f32.gmra.mrb[10].mxu1 %vm263_vm2, %v497_v49 }
 0x30f   :  { %892 = vmatprep.mubr.msk.f32.mxu1 %vm1038_vm3, %v1039_v51 }
 0x3dd   :  { %v880_v54 = vpop.f32.mrb[8].mxu1 }
 0x3de   :  { %v606_v55 = vadd.f32 %v880_v54, %v510_v52  ;;  %v600_v56 = vpop.f32.mrb[9].mxu1 }
 0x3df   :  { %v601_v57 = vadd.f32 %v600_v56, %v505_v53 }
 0x3e0   :  { %1004 = vtanh.f32 %v606_v55 }
 0x3e1   :  { %1006 = vtanh.f32 %v601_v57  ;;  %v883_v59 = vpop.f32.mrb[10].mxu1 }
 0x3e2   :  { %v616_v61 = vadd.f32 %v883_v59, %v520_v58  ;;  %v610_v62 = vpop.f32.mrb[11].mxu1 }
 0x3e3   :  { %v611_v63 = vadd.f32 %v610_v62, %v515_v60 }
 0x3e4   :  { %1008 = vtanh.f32 %v616_v61 }
 0x3e5   :  { %1010 = vtanh.f32 %v611_v63 }
 0x3ea   :  { %v1005_v0 = vpop.eup %1004 }
 0x3eb   :  { %v1007_v1 = vpop.eup %1006 }
 0x3ec   :  { %v968_v2 = vpack.c.bf16 %v1005_v0, %v1007_v1 }
 0x3ee   :  { %v1009_v3 = vpop.eup %1008  ;;  %969 = vmatpush3.bf16.msra.mxu1 %v968_v2 }
 0x3ef   :  { %v1011_v4 = vpop.eup %1010  ;;  %970 = vmatprep.subr.bf16.mxu1 %v1037_v50 }
 0x3f0   :  { %v971_v5 = vpack.c.bf16 %v1009_v3, %v1011_v4 }
 0x3f2   :  { %972 = vmatpush3.bf16.msra.mxu1 %v971_v5 }
 0x3f5   :  { %893 = vmatmul.mubr.msk.f32.vlgmr.msra.gmra.mrb[12].mxu1 %vm263_vm2, %v623_v6 }
 0x4c8   :  { %v703_v12 = vpop.f32.mrb[12].mxu1 }
 0x4c9   :  { %v704_v13 = vadd.f32 %v703_v12, %v633_v11  ;;  %v894_v14 = vpop.f32.mrb[13].mxu1 }
 0x4cb   :  { %707 = vst [vmem:[#allocation3] sm:$0x1] %v704_v13 }
 0x4cc   :  { %1023 = shalt.err (!%p1020_p4)
}
 0x4cd   :  { %s1024_s1 = scalar_lea.hbm %s1329_s11, 16 }
 0x4ce   :  { %p1025_p5 = scmp.ne.s32.totalorder %s1329_s11, %s1024_s1  ;;  %p1028_p6 = scmp.lt.u32.totalorder %s1024_s1, %s1329_s11 }
 0x4d0   :  { %p1030_p7 = pnand %p1028_p6, %p1025_p5 }
 0x4d2   :  { %1033 = shalt.err (!%p1030_p7)
}
 0x4d3   :  { %717 = dma.vmem_to_hbm [thread:$0]  %s715_s0, 16, %s1329_s11, [#allocation4]  }
 0x4d4   :  { %1034 = dma.done.wait [#allocation4], 16  }
 0x4d5   :  { %1035 = vsyncadd [#allocation4], 4294967280 }
 0x4d6   :  { %721 = vsyncpa [#allocation4], 1 }

</bundles_post_ra>
